<compile_context>
chip_gen: v7x
topology: tpu7x:2x2x1
jax: 0.10.0
libtpu: 0.0.40
codegen_flags: <defaults>
</compile_context>

<pallas_src>
import functools

import jax
import jax.numpy as jnp
import numpy as np
from jax.experimental import pallas as pl
from jax.experimental.pallas import tpu as pltpu


def _round_up(x, m):
    return ((x + m - 1) // m) * m


# ----------------------------- Pallas kernel ------------------------------- #
def _dns_model_kernel(top_ref, bot_ref, wt_ref, wb_ref,
                      w1m_ref, w1r_ref, w1i_ref, b1_ref, w2_ref, b2_ref,
                      out_ref, *, n_freq):
    # Encoder (STFT filterbank conv1d):  frame = [chunk_t | chunk_{t+1}]  ==>
    #   frame @ Wstft == chunk_t @ W_top + chunk_{t+1} @ W_bot   (f32 accumulate)
    spec = (jnp.dot(top_ref[...], wt_ref[...], preferred_element_type=jnp.float32)
            + jnp.dot(bot_ref[...], wb_ref[...], preferred_element_type=jnp.float32))  # (tm, 2F)

    re = spec[:, :n_freq]
    im = spec[:, n_freq:]
    mag = jnp.sqrt(re * re + im * im)                                         # f32, VPU/EUP

    # magreim + first Linear without materializing the concat:
    #   [mag|re|im] @ W1 == mag @ W1[:F] + re @ W1[F:2F] + im @ W1[2F:]
    cdt = w1m_ref.dtype
    h = (jnp.dot(mag.astype(cdt), w1m_ref[...], preferred_element_type=jnp.float32)
         + jnp.dot(re.astype(cdt), w1r_ref[...], preferred_element_type=jnp.float32)
         + jnp.dot(im.astype(cdt), w1i_ref[...], preferred_element_type=jnp.float32)
         + b1_ref[...])
    h = jnp.maximum(h, 0.0)
    logits = (jnp.dot(h.astype(w2_ref.dtype), w2_ref[...],
                      preferred_element_type=jnp.float32) + b2_ref[...])
    mask = jax.nn.sigmoid(logits)                                             # (tm, 2F)

    # apply_real_mask: elementwise multiply of the complex TF rep by the real mask.
    out_ref[...] = (spec * mask).astype(out_ref.dtype)


# ------------------------------- Wrapper ------------------------------------ #
def dns_model_forward(x, params, *, win, hop, tile_m_max=512,
                      compute_dtype=jnp.bfloat16):
    """x: (B, S) waveform. Returns masked_tf_rep of shape (B, 2F, T) (torch NCT)."""
    wstft, w1, b1, w2, b2 = params
    if x.ndim == 1:
        x = x[None, :]
    assert win == 2 * hop, "kernel assumes 50%-overlap STFT framing (win == 2*hop)"
    B, S = x.shape
    T = (S - win) // hop + 1
    N = wstft.shape[1]
    F = N // 2

    # Framing without an XLA gather: both frame halves are contiguous slices.
    x_top = x[:, :T * hop].reshape(B * T, hop)          # chunk_t
    x_bot = x[:, hop:(T + 1) * hop].reshape(B * T, hop)  # chunk_{t+1}

    # Split weights so the kernel never concatenates.
    wt, wb = wstft[:hop], wstft[hop:]
    w1m, w1r, w1i = w1[:F], w1[F:2 * F], w1[2 * F:]

    # bf16 MXU inputs (f32 accumulate); biases / elementwise math stay f32.
    x_top = x_top.astype(compute_dtype)
    x_bot = x_bot.astype(compute_dtype)
    wt = wt.astype(compute_dtype)
    wb = wb.astype(compute_dtype)
    w1m = w1m.astype(compute_dtype)
    w1r = w1r.astype(compute_dtype)
    w1i = w1i.astype(compute_dtype)
    w2c = w2.astype(compute_dtype)

    # Row tiling over the flattened (B*T) dimension.
    M = B * T
    tile_m = min(tile_m_max, _round_up(M, 8))
    M_pad = _round_up(M, tile_m)
    if M_pad != M:
        pad = M_pad - M
        x_top = jnp.pad(x_top, ((0, pad), (0, 0)))
        x_bot = jnp.pad(x_bot, ((0, pad), (0, 0)))

    def full(shape):
        return pl.BlockSpec(shape, lambda i: (0, 0))

    out = pl.pallas_call(
        functools.partial(_dns_model_kernel, n_freq=F),
        out_shape=jax.ShapeDtypeStruct((M_pad, N), jnp.float32),
        grid_spec=pltpu.PrefetchScalarGridSpec(
            num_scalar_prefetch=0,
            grid=(M_pad // tile_m,),
            in_specs=[
                pl.BlockSpec((tile_m, hop), lambda i: (i, 0)),   # x_top rows
                pl.BlockSpec((tile_m, hop), lambda i: (i, 0)),   # x_bot rows
                full(wt.shape), full(wb.shape),
                full(w1m.shape), full(w1r.shape), full(w1i.shape),
                full(b1.shape), full(w2c.shape), full(b2.shape),
            ],
            out_specs=pl.BlockSpec((tile_m, N), lambda i: (i, 0)),
        ),
        compiler_params=pltpu.CompilerParams(dimension_semantics=("parallel",)),
    )(x_top, x_bot, wt, wb, w1m, w1r, w1i, b1, w2c, b2)

    out = out[:M].reshape(B, T, N)
    # Lane-dense (T, 2F) layout inside the kernel; NCT transpose left to XLA.
    return jnp.transpose(out, (0, 2, 1))


# --------------------------- Deterministic params --------------------------- #
def init_params(key, *, win, n_freq, hidden):
    # STFT filterbank (windowed cos / -sin filters), deterministic.
    t = jnp.arange(win, dtype=jnp.float32)
    f = jnp.arange(n_freq, dtype=jnp.float32)
    ang = 2.0 * jnp.pi * f[None, :] * t[:, None] / win                        # (WIN, F)
    window = 0.5 - 0.5 * jnp.cos(2.0 * jnp.pi * t / win)                      # Hann
    cos_f = jnp.cos(ang) * window[:, None]
    sin_f = -jnp.sin(ang) * window[:, None]
    wstft = jnp.concatenate([cos_f, sin_f], axis=1) / jnp.sqrt(float(win))    # (WIN, 2F)

    k1, k2, k3, k4 = jax.random.split(key, 4)
    w1 = 0.05 * jax.random.normal(k1, (3 * n_freq, hidden), jnp.float32)
    b1 = 0.01 * jax.random.normal(k2, (1, hidden), jnp.float32)
    w2 = 0.05 * jax.random.normal(k3, (hidden, 2 * n_freq), jnp.float32)
    b2 = 0.01 * jax.random.normal(k4, (1, 2 * n_freq), jnp.float32)
    return wstft, w1, b1, w2, b2


# ------------------------------ JAX reference -------------------------------- #
def reference_forward(x, params, *, win, hop, compute_dtype=jnp.bfloat16):
    """Module-faithful forward; matmul inputs cast to `compute_dtype` (f32 accumulate)
    at the same points as the kernel so the comparison is dtype-matched."""
    wstft, w1, b1, w2, b2 = params
    B, S = x.shape
    T = (S - win) // hop + 1
    idx = hop * jnp.arange(T)[:, None] + jnp.arange(win)[None, :]
    frames = x[:, idx].astype(compute_dtype)                                  # (B, T, WIN)
    spec = jnp.einsum("btw,wn->btn", frames, wstft.astype(compute_dtype),
                      preferred_element_type=jnp.float32)                     # (B, T, 2F)
    F = wstft.shape[1] // 2
    re, im = spec[..., :F], spec[..., F:]
    mag = jnp.sqrt(re * re + im * im)
    to_masker = jnp.concatenate([mag, re, im], axis=-1).astype(compute_dtype)
    h = jnp.maximum(
        jnp.einsum("bti,ih->bth", to_masker, w1.astype(compute_dtype),
                   preferred_element_type=jnp.float32) + b1, 0.0)
    mask = jax.nn.sigmoid(
        jnp.einsum("bth,hn->btn", h.astype(compute_dtype), w2.astype(compute_dtype),
                   preferred_element_type=jnp.float32) + b2)
    return jnp.transpose(spec * mask, (0, 2, 1))                              # (B, 2F, T)


if __name__ == "__main__":
    WIN, HOP = 128, 64       # STFT kernel_size / stride (50% overlap)
    N_FREQ = 128             # freq bins -> 2F = 256 encoder channels
    HIDDEN = 128
    T_FRAMES = 16
    B = 2
    S = HOP * (T_FRAMES - 1) + WIN                                            # 1088 samples

    key = jax.random.PRNGKey(0)
    kx, kp = jax.random.split(key)
    x = jax.random.normal(kx, (B, S), jnp.float32)
    params = init_params(kp, win=WIN, n_freq=N_FREQ, hidden=HIDDEN)

    out = dns_model_forward(x, params, win=WIN, hop=HOP)
    out = jax.block_until_ready(out)

    ref = reference_forward(x, params, win=WIN, hop=HOP)
    # bf16 MXU inputs on both sides; only f32 accumulation-order differences remain.
    np.testing.assert_allclose(np.asarray(out), np.asarray(ref), rtol=1e-2, atol=1e-2)

    print("KERNEL_OK")
</pallas_src>

<mosaic_0001>
module attributes {stable_mosaic.version = 11 : i64} {
  func.func @_dns_model_kernel(%arg0: i32, %arg1: memref<32x64xbf16, #tpu.memory_space<vmem>>, %arg2: memref<32x64xbf16, #tpu.memory_space<vmem>>, %arg3: memref<64x256xbf16, #tpu.memory_space<vmem>>, %arg4: memref<64x256xbf16, #tpu.memory_space<vmem>>, %arg5: memref<128x128xbf16, #tpu.memory_space<vmem>>, %arg6: memref<128x128xbf16, #tpu.memory_space<vmem>>, %arg7: memref<128x128xbf16, #tpu.memory_space<vmem>>, %arg8: memref<1x128xf32, #tpu.memory_space<vmem>>, %arg9: memref<128x256xbf16, #tpu.memory_space<vmem>>, %arg10: memref<1x256xf32, #tpu.memory_space<vmem>>, %arg11: memref<32x256xf32, #tpu.memory_space<vmem>>) attributes {dimension_semantics = [#tpu.dimension_semantics<parallel>], iteration_bounds = array<i64: 1>, scalar_prefetch = 0 : i64, scratch_operands = 0 : i64, tpu.core_type = #tpu.core_type<tc>, window_params = [{transform_indices = @transform_0, window_bounds = array<i64: 32, 64>}, {transform_indices = @transform_1, window_bounds = array<i64: 32, 64>}, {pipeline_mode = #tpu.pipeline_mode<synchronous>, transform_indices = @transform_2, window_bounds = array<i64: 64, 256>}, {pipeline_mode = #tpu.pipeline_mode<synchronous>, transform_indices = @transform_3, window_bounds = array<i64: 64, 256>}, {pipeline_mode = #tpu.pipeline_mode<synchronous>, transform_indices = @transform_4, window_bounds = array<i64: 128, 128>}, {pipeline_mode = #tpu.pipeline_mode<synchronous>, transform_indices = @transform_5, window_bounds = array<i64: 128, 128>}, {pipeline_mode = #tpu.pipeline_mode<synchronous>, transform_indices = @transform_6, window_bounds = array<i64: 128, 128>}, {pipeline_mode = #tpu.pipeline_mode<synchronous>, transform_indices = @transform_7, window_bounds = array<i64: 1, 128>}, {pipeline_mode = #tpu.pipeline_mode<synchronous>, transform_indices = @transform_8, window_bounds = array<i64: 128, 256>}, {pipeline_mode = #tpu.pipeline_mode<synchronous>, transform_indices = @transform_9, window_bounds = array<i64: 1, 256>}, {transform_indices = @transform_10, window_bounds = array<i64: 32, 256>}]} {
    %c0 = arith.constant 0 : index
    %c0_0 = arith.constant 0 : index
    %0 = vector.load %arg1[%c0, %c0_0] : memref<32x64xbf16, #tpu.memory_space<vmem>>, vector<32x64xbf16>
    %c0_1 = arith.constant 0 : index
    %c0_2 = arith.constant 0 : index
    %1 = vector.load %arg3[%c0_1, %c0_2] : memref<64x256xbf16, #tpu.memory_space<vmem>>, vector<64x256xbf16>
    %cst = arith.constant dense<0.000000e+00> : vector<32x256xf32>
    %2 = tpu.matmul %0, %1, %cst {dimension_numbers = #tpu.dot_dimension_numbers<[1], [0], [0], [1], [0, 0, 1, 1], [], []>} : vector<32x64xbf16>, vector<64x256xbf16>, vector<32x256xf32> -> vector<32x256xf32>
    %c0_3 = arith.constant 0 : index
    %c0_4 = arith.constant 0 : index
    %3 = vector.load %arg2[%c0_3, %c0_4] : memref<32x64xbf16, #tpu.memory_space<vmem>>, vector<32x64xbf16>
    %c0_5 = arith.constant 0 : index
    %c0_6 = arith.constant 0 : index
    %4 = vector.load %arg4[%c0_5, %c0_6] : memref<64x256xbf16, #tpu.memory_space<vmem>>, vector<64x256xbf16>
    %cst_7 = arith.constant dense<0.000000e+00> : vector<32x256xf32>
    %5 = tpu.matmul %3, %4, %cst_7 {dimension_numbers = #tpu.dot_dimension_numbers<[1], [0], [0], [1], [0, 0, 1, 1], [], []>} : vector<32x64xbf16>, vector<64x256xbf16>, vector<32x256xf32> -> vector<32x256xf32>
    %6 = arith.addf %2, %5 : vector<32x256xf32>
    %7 = vector.extract_strided_slice %6 {offsets = [0, 0], sizes = [32, 128], strides = [1, 1]} : vector<32x256xf32> to vector<32x128xf32>
    %8 = vector.extract_strided_slice %6 {offsets = [0, 128], sizes = [32, 128], strides = [1, 1]} : vector<32x256xf32> to vector<32x128xf32>
    %9 = arith.mulf %7, %7 : vector<32x128xf32>
    %10 = arith.mulf %8, %8 : vector<32x128xf32>
    %11 = arith.addf %9, %10 : vector<32x128xf32>
    %12 = math.sqrt %11 : vector<32x128xf32>
    %13 = arith.truncf %12 : vector<32x128xf32> to vector<32x128xbf16>
    %c0_8 = arith.constant 0 : index
    %c0_9 = arith.constant 0 : index
    %14 = vector.load %arg5[%c0_8, %c0_9] : memref<128x128xbf16, #tpu.memory_space<vmem>>, vector<128x128xbf16>
    %cst_10 = arith.constant dense<0.000000e+00> : vector<32x128xf32>
    %15 = tpu.matmul %13, %14, %cst_10 {dimension_numbers = #tpu.dot_dimension_numbers<[1], [0], [0], [1], [0, 0, 1, 1], [], []>} : vector<32x128xbf16>, vector<128x128xbf16>, vector<32x128xf32> -> vector<32x128xf32>
    %16 = arith.truncf %7 : vector<32x128xf32> to vector<32x128xbf16>
    %c0_11 = arith.constant 0 : index
    %c0_12 = arith.constant 0 : index
    %17 = vector.load %arg6[%c0_11, %c0_12] : memref<128x128xbf16, #tpu.memory_space<vmem>>, vector<128x128xbf16>
    %cst_13 = arith.constant dense<0.000000e+00> : vector<32x128xf32>
    %18 = tpu.matmul %16, %17, %cst_13 {dimension_numbers = #tpu.dot_dimension_numbers<[1], [0], [0], [1], [0, 0, 1, 1], [], []>} : vector<32x128xbf16>, vector<128x128xbf16>, vector<32x128xf32> -> vector<32x128xf32>
    %19 = arith.addf %15, %18 : vector<32x128xf32>
    %20 = arith.truncf %8 : vector<32x128xf32> to vector<32x128xbf16>
    %c0_14 = arith.constant 0 : index
    %c0_15 = arith.constant 0 : index
    %21 = vector.load %arg7[%c0_14, %c0_15] : memref<128x128xbf16, #tpu.memory_space<vmem>>, vector<128x128xbf16>
    %cst_16 = arith.constant dense<0.000000e+00> : vector<32x128xf32>
    %22 = tpu.matmul %20, %21, %cst_16 {dimension_numbers = #tpu.dot_dimension_numbers<[1], [0], [0], [1], [0, 0, 1, 1], [], []>} : vector<32x128xbf16>, vector<128x128xbf16>, vector<32x128xf32> -> vector<32x128xf32>
    %23 = arith.addf %19, %22 : vector<32x128xf32>
    %c0_17 = arith.constant 0 : index
    %c0_18 = arith.constant 0 : index
    %24 = vector.load %arg8[%c0_17, %c0_18] : memref<1x128xf32, #tpu.memory_space<vmem>>, vector<1x128xf32>
    %25 = vector.broadcast %24 : vector<1x128xf32> to vector<32x128xf32>
    %26 = arith.addf %23, %25 : vector<32x128xf32>
    %cst_19 = arith.constant 0.000000e+00 : f32
    %27 = vector.broadcast %cst_19 : f32 to vector<32x128xf32>
    %28 = arith.maximumf %26, %27 : vector<32x128xf32>
    %29 = arith.truncf %28 : vector<32x128xf32> to vector<32x128xbf16>
    %c0_20 = arith.constant 0 : index
    %c0_21 = arith.constant 0 : index
    %30 = vector.load %arg9[%c0_20, %c0_21] : memref<128x256xbf16, #tpu.memory_space<vmem>>, vector<128x256xbf16>
    %cst_22 = arith.constant dense<0.000000e+00> : vector<32x256xf32>
    %31 = tpu.matmul %29, %30, %cst_22 {dimension_numbers = #tpu.dot_dimension_numbers<[1], [0], [0], [1], [0, 0, 1, 1], [], []>} : vector<32x128xbf16>, vector<128x256xbf16>, vector<32x256xf32> -> vector<32x256xf32>
    %c0_23 = arith.constant 0 : index
    %c0_24 = arith.constant 0 : index
    %32 = vector.load %arg10[%c0_23, %c0_24] : memref<1x256xf32, #tpu.memory_space<vmem>>, vector<1x256xf32>
    %33 = vector.broadcast %32 : vector<1x256xf32> to vector<32x256xf32>
    %34 = arith.addf %31, %33 : vector<32x256xf32>
    %35 = arith.negf %34 : vector<32x256xf32>
    %36 = math.exp %35 : vector<32x256xf32>
    %cst_25 = arith.constant 1.000000e+00 : f32
    %37 = vector.broadcast %cst_25 : f32 to vector<32x256xf32>
    %38 = arith.addf %37, %36 : vector<32x256xf32>
    %39 = arith.divf %37, %38 : vector<32x256xf32>
    %40 = arith.mulf %6, %39 : vector<32x256xf32>
    %c0_26 = arith.constant 0 : index
    %c0_27 = arith.constant 0 : index
    %41 = vector.load %arg11[%c0_26, %c0_27] : memref<32x256xf32, #tpu.memory_space<vmem>>, vector<32x256xf32>
    tpu.vector_store %arg11[%c0_26, %c0_27], %40 {strides = array<i32>} : memref<32x256xf32, #tpu.memory_space<vmem>>, vector<32x256xf32>,
    return
  }
  func.func @transform_0(%arg0: i32) -> (i32, i32) {
    %c0_i32 = arith.constant 0 : i32
    %c0_i32_0 = arith.constant 0 : i32
    return %arg0, %c0_i32 : i32, i32
  }
  func.func @transform_1(%arg0: i32) -> (i32, i32) {
    %c0_i32 = arith.constant 0 : i32
    %c0_i32_0 = arith.constant 0 : i32
    return %arg0, %c0_i32 : i32, i32
  }
  func.func @transform_2(%arg0: i32) -> (i32, i32) {
    %c0_i32 = arith.constant 0 : i32
    %c0_i32_0 = arith.constant 0 : i32
    %c0_i32_1 = arith.constant 0 : i32
    return %c0_i32, %c0_i32_0 : i32, i32
  }
  func.func @transform_3(%arg0: i32) -> (i32, i32) {
    %c0_i32 = arith.constant 0 : i32
    %c0_i32_0 = arith.constant 0 : i32
    %c0_i32_1 = arith.constant 0 : i32
    return %c0_i32, %c0_i32_0 : i32, i32
  }
  func.func @transform_4(%arg0: i32) -> (i32, i32) {
    %c0_i32 = arith.constant 0 : i32
    %c0_i32_0 = arith.constant 0 : i32
    %c0_i32_1 = arith.constant 0 : i32
    return %c0_i32, %c0_i32_0 : i32, i32
  }
  func.func @transform_5(%arg0: i32) -> (i32, i32) {
    %c0_i32 = arith.constant 0 : i32
    %c0_i32_0 = arith.constant 0 : i32
    %c0_i32_1 = arith.constant 0 : i32
    return %c0_i32, %c0_i32_0 : i32, i32
  }
  func.func @transform_6(%arg0: i32) -> (i32, i32) {
    %c0_i32 = arith.constant 0 : i32
    %c0_i32_0 = arith.constant 0 : i32
    %c0_i32_1 = arith.constant 0 : i32
    return %c0_i32, %c0_i32_0 : i32, i32
  }
  func.func @transform_7(%arg0: i32) -> (i32, i32) {
    %c0_i32 = arith.constant 0 : i32
    %c0_i32_0 = arith.constant 0 : i32
    %c0_i32_1 = arith.constant 0 : i32
    return %c0_i32, %c0_i32_0 : i32, i32
  }
  func.func @transform_8(%arg0: i32) -> (i32, i32) {
    %c0_i32 = arith.constant 0 : i32
    %c0_i32_0 = arith.constant 0 : i32
    %c0_i32_1 = arith.constant 0 : i32
    return %c0_i32, %c0_i32_0 : i32, i32
  }
  func.func @transform_9(%arg0: i32) -> (i32, i32) {
    %c0_i32 = arith.constant 0 : i32
    %c0_i32_0 = arith.constant 0 : i32
    %c0_i32_1 = arith.constant 0 : i32
    return %c0_i32, %c0_i32_0 : i32, i32
  }
  func.func @transform_10(%arg0: i32) -> (i32, i32) {
    %c0_i32 = arith.constant 0 : i32
    %c0_i32_0 = arith.constant 0 : i32
    return %arg0, %c0_i32 : i32, i32
  }
}

</mosaic_0001>

<bundles_post_ra>
// kernel: tpu_custom_call.1
= control target key start
LH: loop header
LB: loop body
LE: loop exit
PB: predicated region body
PF: predicated region fallthrough
CT: control target
= control target key end

     0   :  { %15 = vsyncpa [#allocation3], 0  ;;  %s1835_s0 = inlined_call_operand.hbm [shape: bf16[32,64], index: 0, kind: input, shape index: {}]   ;;  %s1836_s1 = inlined_call_operand.hbm [shape: bf16[32,64], index: 1, kind: input, shape index: {}]   ;;  %s1837_s2 = inlined_call_operand.hbm [shape: bf16[64,256], index: 2, kind: input, shape index: {}]   ;;  %s1838_s3 = inlined_call_operand.hbm [shape: bf16[64,256], index: 3, kind: input, shape index: {}]   ;;  %s1839_s4 = inlined_call_operand.hbm [shape: bf16[128,128], index: 4, kind: input, shape index: {}]   ;;  %s1840_s5 = inlined_call_operand.hbm [shape: bf16[128,128], index: 5, kind: input, shape index: {}]   ;;  %s1841_s6 = inlined_call_operand.hbm [shape: bf16[128,128], index: 6, kind: input, shape index: {}]   ;;  %s1842_s7 = inlined_call_operand.vmem [shape: f32[1,128], index: 7, kind: input, shape index: {}]   ;;  %s1843_s8 = inlined_call_operand.hbm [shape: bf16[128,256], index: 8, kind: input, shape index: {}]   ;;  %s1844_s9 = inlined_call_operand.vmem [shape: f32[1,256], index: 9, kind: input, shape index: {}]   ;;  %s1845_s10 = inlined_call_operand.hbm [shape: f32[32,256], index: 10, kind: output, shape index: {}]  }
   0x1   :  { %16 = vsyncpa [#allocation6], 0 }
   0x2   :  { %17 = vsyncpa [#allocation9], 0 }
   0x3   :  { %18 = vsyncpa [#allocation12], 0 }
   0x4   :  { %19 = vsyncpa [#allocation15], 0 }
   0x5   :  { %20 = vsyncpa [#allocation4], 0  ;;  %s1562_s13 = smov [#allocation5]   ;;  %s1352_s17 = scalar_lea.hbm %s1836_s1, 256 }
   0x6   :  { %s38_s14 = sshll.u32 %s1562_s13, 4  ;;  %p1353_p0 = scmp.ne.s32.totalorder %s1836_s1, %s1352_s17  ;;  %s39_s14 = int_to_ptr.vmem [resolvable:$true] %s38_s14 }
   0x7   :  { %p1356_p1 = scmp.lt.u32.totalorder %s1352_s17, %s1836_s1 }
   0x9   :  { %p1358_p2 = pnand %p1356_p1, %p1353_p0 }
   0xb   :  { %1361 = shalt.err (!%p1358_p2)
}
   0xc   :  { %s1362_s22 = scalar_lea.vmem %s39_s14, 256  ;;  %p1367_p4 = scmp.lt.s32.totalorder %s39_s14, %s39_s14 }
   0xd   :  { %p1363_p3 = scmp.ne.s32.totalorder %s39_s14, %s1362_s22  ;;  %p1368_p5 = scmp.lt.s32.totalorder %s1362_s22, %s1362_s22 }
   0xf   :  { %p1369_p6 = por %p1368_p5, %p1367_p4 }
  0x11   :  { %p1370_p7 = pnand %p1369_p6, %p1363_p3 }
  0x13   :  { %1373 = shalt.err (!%p1370_p7)
}
  0x14   :  { %s1563_s23 = smov 64   ;;  %s1564_s24 = smov 4  }
  0x15   :  { %44 = dma.hbm_to_vmem [thread:$0]  %s1836_s1, 256, %s39_s14, [#allocation6], %s1563_s23, %s1563_s23, %s1564_s24  }
  0x16   :  { %s1565_s27 = smov [#allocation8]   ;;  %s1566_s29 = smov [#allocation11]  }
  0x17   :  { %s62_s28 = sshll.u32 %s1565_s27, 4  ;;  %s86_s30 = sshll.u32 %s1566_s29, 4  ;;  %s63_s28 = int_to_ptr.vmem [resolvable:$true] %s62_s28  ;;  %s87_s30 = int_to_ptr.vmem [resolvable:$true] %s86_s30 }
  0x18   :  { %s1374_s13 = scalar_lea.hbm %s1838_s3, 1024 }
  0x19   :  { %p1375_p8 = scmp.ne.s32.totalorder %s1838_s3, %s1374_s13  ;;  %p1378_p9 = scmp.lt.u32.totalorder %s1374_s13, %s1838_s3 }
  0x1b   :  { %p1380_p10 = pnand %p1378_p9, %p1375_p8 }
  0x1d   :  { %1383 = shalt.err (!%p1380_p10)
}
  0x1e   :  { %s1384_s1 = scalar_lea.vmem %s63_s28, 1024  ;;  %p1389_p12 = scmp.lt.s32.totalorder %s63_s28, %s63_s28 }
  0x1f   :  { %p1385_p11 = scmp.ne.s32.totalorder %s63_s28, %s1384_s1  ;;  %p1390_p13 = scmp.lt.s32.totalorder %s1384_s1, %s1384_s1 }
  0x21   :  { %p1391_p0 = por %p1390_p13, %p1389_p12 }
  0x23   :  { %p1392_p1 = pnand %p1391_p0, %p1385_p11 }
  0x25   :  { %1395 = shalt.err (!%p1392_p1)
}
  0x26   :  { %s1567_s14 = smov 128   ;;  %s1568_s19 = smov 8  }
  0x27   :  { %68 = dma.hbm_to_vmem [thread:$0]  %s1838_s3, 1024, %s63_s28, [#allocation9], %s1567_s14, %s1567_s14, %s1568_s19  }
  0x28   :  { %s1396_s26 = scalar_lea.hbm %s1840_s5, 1024 }
  0x29   :  { %p1397_p2 = scmp.ne.s32.totalorder %s1840_s5, %s1396_s26  ;;  %p1400_p3 = scmp.lt.u32.totalorder %s1396_s26, %s1840_s5 }
  0x2b   :  { %p1402_p4 = pnand %p1400_p3, %p1397_p2 }
  0x2d   :  { %1405 = shalt.err (!%p1402_p4)
}
  0x2e   :  { %s1406_s13 = scalar_lea.vmem %s87_s30, 1024  ;;  %p1411_p6 = scmp.lt.s32.totalorder %s87_s30, %s87_s30 }
  0x2f   :  { %p1407_p5 = scmp.ne.s32.totalorder %s87_s30, %s1406_s13  ;;  %p1412_p7 = scmp.lt.s32.totalorder %s1406_s13, %s1406_s13 }
  0x31   :  { %p1413_p8 = por %p1412_p7, %p1411_p6 }
  0x33   :  { %p1414_p9 = pnand %p1413_p8, %p1407_p5 }
  0x35   :  { %1417 = shalt.err (!%p1414_p9)
}
  0x36   :  { %92 = dma.hbm_to_vmem [thread:$0]  %s1840_s5, 1024, %s87_s30, [#allocation12], %s1563_s23, %s1563_s23, %s1564_s24  }
  0x37   :  { %s1569_s15 = smov [#allocation2]   ;;  %s1570_s17 = smov [#allocation7]  }
  0x38   :  { %s26_s16 = sshll.u32 %s1569_s15, 4  ;;  %s50_s18 = sshll.u32 %s1570_s17, 4  ;;  %s27_s16 = int_to_ptr.vmem [resolvable:$true] %s26_s16  ;;  %s51_s18 = int_to_ptr.vmem [resolvable:$true] %s50_s18 }
  0x39   :  { %s1418_s21 = scalar_lea.hbm %s1835_s0, 256 }
  0x3a   :  { %p1419_p10 = scmp.ne.s32.totalorder %s1835_s0, %s1418_s21  ;;  %p1422_p11 = scmp.lt.u32.totalorder %s1418_s21, %s1835_s0 }
  0x3c   :  { %p1424_p12 = pnand %p1422_p11, %p1419_p10 }
  0x3e   :  { %1427 = shalt.err (!%p1424_p12)
}
  0x3f   :  { %s1428_s5 = scalar_lea.vmem %s27_s16, 256  ;;  %p1433_p0 = scmp.lt.s32.totalorder %s27_s16, %s27_s16 }
  0x40   :  { %p1429_p13 = scmp.ne.s32.totalorder %s27_s16, %s1428_s5  ;;  %p1434_p1 = scmp.lt.s32.totalorder %s1428_s5, %s1428_s5 }
  0x42   :  { %p1435_p2 = por %p1434_p1, %p1433_p0 }
  0x44   :  { %p1436_p3 = pnand %p1435_p2, %p1429_p13 }
  0x46   :  { %1439 = shalt.err (!%p1436_p3)
}
  0x47   :  { %32 = dma.hbm_to_vmem [thread:$0]  %s1835_s0, 256, %s27_s16, [#allocation3], %s1563_s23, %s1563_s23, %s1564_s24  }
  0x48   :  { %s1440_s13 = scalar_lea.hbm %s1837_s2, 1024 }
  0x49   :  { %p1441_p4 = scmp.ne.s32.totalorder %s1837_s2, %s1440_s13  ;;  %p1444_p5 = scmp.lt.u32.totalorder %s1440_s13, %s1837_s2 }
  0x4b   :  { %p1446_p6 = pnand %p1444_p5, %p1441_p4 }
  0x4d   :  { %1449 = shalt.err (!%p1446_p6)
}
  0x4e   :  { %s1450_s1 = scalar_lea.vmem %s51_s18, 1024  ;;  %p1455_p8 = scmp.lt.s32.totalorder %s51_s18, %s51_s18 }
  0x4f   :  { %p1451_p7 = scmp.ne.s32.totalorder %s51_s18, %s1450_s1  ;;  %p1456_p9 = scmp.lt.s32.totalorder %s1450_s1, %s1450_s1 }
  0x51   :  { %p1457_p10 = por %p1456_p9, %p1455_p8 }
  0x53   :  { %p1458_p11 = pnand %p1457_p10, %p1451_p7 }
  0x55   :  { %1461 = shalt.err (!%p1458_p11)
}
  0x56   :  { %56 = dma.hbm_to_vmem [thread:$0]  %s1837_s2, 1024, %s51_s18, [#allocation6], %s1567_s14, %s1567_s14, %s1568_s19  }
  0x57   :  { %s1571_s20 = smov [#allocation10]   ;;  %s1572_s22 = smov [#allocation13]  }
  0x58   :  { %s74_s21 = sshll.u32 %s1571_s20, 4  ;;  %s98_s25 = sshll.u32 %s1572_s22, 4  ;;  %s75_s21 = int_to_ptr.vmem [resolvable:$true] %s74_s21  ;;  %s99_s25 = int_to_ptr.vmem [resolvable:$true] %s98_s25 }
  0x59   :  { %s1462_s5 = scalar_lea.hbm %s1839_s4, 1024 }
  0x5a   :  { %p1463_p12 = scmp.ne.s32.totalorder %s1839_s4, %s1462_s5  ;;  %p1466_p13 = scmp.lt.u32.totalorder %s1462_s5, %s1839_s4 }
  0x5c   :  { %p1468_p0 = pnand %p1466_p13, %p1463_p12 }
  0x5e   :  { %1471 = shalt.err (!%p1468_p0)
}
  0x5f   :  { %s1472_s2 = scalar_lea.vmem %s75_s21, 1024  ;;  %p1477_p2 = scmp.lt.s32.totalorder %s75_s21, %s75_s21 }
  0x60   :  { %p1473_p1 = scmp.ne.s32.totalorder %s75_s21, %s1472_s2  ;;  %p1478_p3 = scmp.lt.s32.totalorder %s1472_s2, %s1472_s2 }
  0x62   :  { %p1479_p4 = por %p1478_p3, %p1477_p2 }
  0x64   :  { %p1480_p5 = pnand %p1479_p4, %p1473_p1 }
  0x66   :  { %1483 = shalt.err (!%p1480_p5)
}
  0x67   :  { %80 = dma.hbm_to_vmem [thread:$0]  %s1839_s4, 1024, %s75_s21, [#allocation9], %s1563_s23, %s1563_s23, %s1564_s24  }
  0x68   :  { %s1484_s15 = scalar_lea.hbm %s1841_s6, 1024 }
  0x69   :  { %p1485_p6 = scmp.ne.s32.totalorder %s1841_s6, %s1484_s15  ;;  %p1488_p7 = scmp.lt.u32.totalorder %s1484_s15, %s1841_s6 }
  0x6b   :  { %p1490_p8 = pnand %p1488_p7, %p1485_p6 }
  0x6d   :  { %1493 = shalt.err (!%p1490_p8)
}
  0x6e   :  { %s1494_s20 = scalar_lea.vmem %s99_s25, 1024  ;;  %p1499_p10 = scmp.lt.s32.totalorder %s99_s25, %s99_s25 }
  0x6f   :  { %p1495_p9 = scmp.ne.s32.totalorder %s99_s25, %s1494_s20  ;;  %p1500_p11 = scmp.lt.s32.totalorder %s1494_s20, %s1494_s20 }
  0x71   :  { %p1501_p12 = por %p1500_p11, %p1499_p10 }
  0x73   :  { %p1502_p13 = pnand %p1501_p12, %p1495_p9 }
  0x75   :  { %1505 = shalt.err (!%p1502_p13)
}
  0x76   :  { %104 = dma.hbm_to_vmem [thread:$0]  %s1841_s6, 1024, %s99_s25, [#allocation12], %s1563_s23, %s1563_s23, %s1564_s24  }
  0x77   :  { %s1573_s22 = smov [#allocation14]   ;;  %s1506_s30 = scalar_lea.hbm %s1843_s8, 2048 }
  0x78   :  { %s112_s26 = sshll.u32 %s1573_s22, 4  ;;  %p1507_p0 = scmp.ne.s32.totalorder %s1843_s8, %s1506_s30  ;;  %s113_s26 = int_to_ptr.vmem [resolvable:$true] %s112_s26 }
  0x79   :  { %p1510_p1 = scmp.lt.u32.totalorder %s1506_s30, %s1843_s8 }
  0x7b   :  { %p1512_p2 = pnand %p1510_p1, %p1507_p0 }
  0x7d   :  { %1515 = shalt.err (!%p1512_p2)
}
  0x7e   :  { %s1516_s18 = scalar_lea.vmem %s113_s26, 2048  ;;  %p1521_p4 = scmp.lt.s32.totalorder %s113_s26, %s113_s26 }
  0x7f   :  { %p1517_p3 = scmp.ne.s32.totalorder %s113_s26, %s1516_s18  ;;  %p1522_p5 = scmp.lt.s32.totalorder %s1516_s18, %s1516_s18 }
  0x81   :  { %p1523_p6 = por %p1522_p5, %p1521_p4 }
  0x83   :  { %p1524_p7 = pnand %p1523_p6, %p1517_p3 }
  0x85   :  { %1527 = shalt.err (!%p1524_p7)
}
  0x86   :  { %118 = dma.hbm_to_vmem [thread:$0]  %s1843_s8, 2048, %s113_s26, [#allocation15], %s1567_s14, %s1567_s14, %s1568_s19  }
  0x87   :  { %1550 = dma.done.wait [#allocation3], 256  }
  0x88   :  { %1551 = vsyncadd [#allocation3], 4294967040 }
  0x89   :  { %1552 = dma.done.wait [#allocation6], 1280  }
  0x8a   :  { %1553 = vsyncadd [#allocation6], 4294966016 }
  0x8b   :  { %1554 = dma.done.wait [#allocation9], 2048  }
  0x8c   :  { %1555 = vsyncadd [#allocation9], 4294965248 }
  0x8d   :  { %1556 = dma.done.wait [#allocation12], 2048  }
  0x8e   :  { %1557 = vsyncadd [#allocation12], 4294965248 }
  0x8f   :  { %1558 = dma.done.wait [#allocation15], 2048  }
  0x90   :  { %1559 = vsyncadd [#allocation15], 4294965248  ;;  %v1574_v0 = vmov 0   ;;  %v1236_v1 = vld [vmem:[#allocation8 + $0x4] ss:$8 sps:$4 sm:$0xff]   ;;  %v1248_v9 = vld [vmem:[#allocation5] sm:$0xff]  }
  0x91   :  { %259 = vmatprep.mubr.bf16.mxu0 %v1574_v0  ;;  %v1238_v2 = vld [vmem:[#allocation8] ss:$8 sps:$4 sm:$0xff]   ;;  %227 = vmatprep.subr.bf16.mxu0 %v1236_v1  ;;  %v1239_v3 = vld [vmem:[#allocation8 + $0x14] ss:$8 sps:$4 sm:$0xff]   ;;  %v1241_v4 = vld [vmem:[#allocation8 + $0x10] ss:$8 sps:$4 sm:$0xff]  }
  0x92   :  { %228 = vmatpush1.bf16.msra.mxu0 %v1238_v2  ;;  %v1242_v5 = vld [vmem:[#allocation8 + $0x24] ss:$8 sps:$4 sm:$0xff]   ;;  %v1244_v6 = vld [vmem:[#allocation8 + $0x20] ss:$8 sps:$4 sm:$0xff]   ;;  %v1245_v7 = vld [vmem:[#allocation8 + $0x34] ss:$8 sps:$4 sm:$0xff]  }
  0x93   :  { %229 = vmatprep.subr.bf16.mxu0 %v1239_v3  ;;  %v1247_v8 = vld [vmem:[#allocation8 + $0x30] ss:$8 sps:$4 sm:$0xff]   ;;  %v1251_v10 = vld [vmem:[#allocation7 + $0x4] ss:$8 sps:$4 sm:$0xff]   ;;  %v1249_v11 = vld [vmem:[#allocation7] ss:$8 sps:$4 sm:$0xff]  }
  0x94   :  { %v1254_v12 = vld [vmem:[#allocation7 + $0x14] ss:$8 sps:$4 sm:$0xff]   ;;  %vm220_vm0 = vcmask 523264   ;;  %v1264_v13 = vld [vmem:[#allocation11] sm:$0xff]   ;;  %v1265_v14 = vld [vmem:[#allocation11 + $0x8] sm:$0xff]  }
  0x95   :  { %v1252_v15 = vld [vmem:[#allocation7 + $0x10] ss:$8 sps:$4 sm:$0xff]   ;;  %1144 = vmatprep.subr.bf16.mxu1 %v1264_v13  ;;  %v1258_v16 = vld [vmem:[#allocation7 + $0x24] ss:$8 sps:$4 sm:$0xff]   ;;  %v1256_v19 = vld [vmem:[#allocation7 + $0x20] ss:$8 sps:$4 sm:$0xff]  }
  0x96   :  { %230 = vmatpush1.bf16.msra.mxu0 %v1241_v4  ;;  %1145 = vmatpush3.bf16.msra.mxu1 %v1264_v13  ;;  %v1266_v17 = vld [vmem:[#allocation11 + $0x10] sm:$0xff]   ;;  %v1255_v18 = vld [vmem:[#allocation5 + $0x8] sm:$0xff]   ;;  %v1268_v23 = vld [vmem:[#allocation11 + $0x20] sm:$0xff]  }
  0x97   :  { %231 = vmatprep.subr.bf16.mxu0 %v1242_v5  ;;  %1146 = vmatprep.subr.bf16.mxu1 %v1265_v14  ;;  %v1261_v20 = vld [vmem:[#allocation7 + $0x34] ss:$8 sps:$4 sm:$0xff]   ;;  %v1259_v22 = vld [vmem:[#allocation7 + $0x30] ss:$8 sps:$4 sm:$0xff]   ;;  %v1262_v24 = vld [vmem:[#allocation2] sm:$0xff]  }
  0x98   :  { %v1267_v21 = vld [vmem:[#allocation11 + $0x18] sm:$0xff]   ;;  %v1263_v25 = vld [vmem:[#allocation2 + $0x8] sm:$0xff]   ;;  %v1270_v27 = vld [vmem:[#allocation11 + $0x30] sm:$0xff]  }
  0x99   :  { %v1269_v26 = vld [vmem:[#allocation11 + $0x28] sm:$0xff]   ;;  %v1271_v28 = vld [vmem:[#allocation11 + $0x38] sm:$0xff]   ;;  %v1272_v29 = vld [vmem:[#allocation10] sm:$0xff]  }
  0x9a   :  { %232 = vmatpush1.bf16.msra.mxu0 %v1244_v6  ;;  %1147 = vmatpush3.bf16.msra.mxu1 %v1265_v14  ;;  %v1288_v30 = vld [vmem:[#allocation14] ss:$8 sps:$4 sm:$0xff]   ;;  %v1290_v31 = vld [vmem:[#allocation14 + $0x4] ss:$8 sps:$4 sm:$0xff]   ;;  %v1293_v32 = vld [vmem:[#allocation14 + $0x14] ss:$8 sps:$4 sm:$0xff]  }
  0x9b   :  { %233 = vmatprep.subr.bf16.mxu0 %v1245_v7  ;;  %1148 = vmatprep.subr.bf16.mxu1 %v1266_v17  ;;  %v1291_v33 = vld [vmem:[#allocation14 + $0x10] ss:$8 sps:$4 sm:$0xff]   ;;  %v1296_v34 = vld [vmem:[#allocation14 + $0x24] ss:$8 sps:$4 sm:$0xff]   ;;  %v1294_v35 = vld [vmem:[#allocation14 + $0x20] ss:$8 sps:$4 sm:$0xff]  }
  0x9c   :  { %v1299_v36 = vld [vmem:[#allocation14 + $0x34] ss:$8 sps:$4 sm:$0xff]   ;;  %v1297_v37 = vld [vmem:[#allocation14 + $0x30] ss:$8 sps:$4 sm:$0xff]   ;;  %v1302_v38 = vld [vmem:[#allocation14 + $0x44] ss:$8 sps:$4 sm:$0xff]  }
  0x9d   :  { %v1300_v39 = vld [vmem:[#allocation14 + $0x40] ss:$8 sps:$4 sm:$0xff]   ;;  %v1305_v40 = vld [vmem:[#allocation14 + $0x54] ss:$8 sps:$4 sm:$0xff]   ;;  %v1303_v41 = vld [vmem:[#allocation14 + $0x50] ss:$8 sps:$4 sm:$0xff]  }
  0x9e   :  { %234 = vmatpush1.bf16.msra.mxu0 %v1247_v8  ;;  %1149 = vmatpush3.bf16.msra.mxu1 %v1266_v17  ;;  %v1273_v62 = vld [vmem:[#allocation10 + $0x8] sm:$0xff]   ;;  %v1274_v4 = vld [vmem:[#allocation10 + $0x10] sm:$0xff]   ;;  %v1275_v8 = vld [vmem:[#allocation10 + $0x18] sm:$0xff]  }
  0x9f   :  { %336 = vmatprep.subr.bf16.mxu0 %v1251_v10  ;;  %1150 = vmatprep.subr.bf16.mxu1 %v1267_v21  ;;  %v1276_v17 = vld [vmem:[#allocation10 + $0x20] sm:$0xff]  }
  0xa1   :  { %1051 = vmatmul.mubr.msk.bf16.vlgmr.msra.gmra.mrb[0].mxu0 %vm220_vm0, %v1248_v9 }
  0xa2   :  { %337 = vmatpush1.bf16.msra.mxu0 %v1249_v11  ;;  %269 = vmatprep.mubr.bf16.mxu0 %v1574_v0 }
  0xa3   :  { %338 = vmatprep.subr.bf16.mxu0 %v1254_v12  ;;  %1151 = vmatpush3.bf16.msra.mxu1 %v1267_v21  ;;  %v1277_v21 = vld [vmem:[#allocation10 + $0x28] sm:$0xff]  }
  0xa4   :  { %1152 = vmatprep.subr.bf16.mxu1 %v1268_v23 }
  0xa6   :  { %339 = vmatpush1.bf16.msra.mxu0 %v1252_v15 }
  0xa7   :  { %340 = vmatprep.subr.bf16.mxu0 %v1258_v16  ;;  %1153 = vmatpush3.bf16.msra.mxu1 %v1268_v23 }
  0xa8   :  { %1154 = vmatprep.subr.bf16.mxu1 %v1269_v26 }
  0xa9   :  { %1052 = vmatmul.mubr.msk.bf16.gmra.mrb[4].mxu0 %vm220_vm0, %v1255_v18 }
  0xaa   :  { %341 = vmatpush1.bf16.msra.mxu0 %v1256_v19  ;;  %368 = vmatprep.mubr.bf16.mxu0 %v1574_v0 }
  0xab   :  { %342 = vmatprep.subr.bf16.mxu0 %v1261_v20  ;;  %1155 = vmatpush3.bf16.msra.mxu1 %v1269_v26 }
  0xac   :  { %1156 = vmatprep.subr.bf16.mxu1 %v1270_v27 }
  0xae   :  { %343 = vmatpush1.bf16.msra.mxu0 %v1259_v22 }
  0xaf   :  { %1157 = vmatpush3.bf16.msra.mxu1 %v1270_v27  ;;  %903 = vmatprep.subr.bf16.mxu0 %v1290_v31  ;;  %v1279_v31 = vld [vmem:[#allocation10 + $0x38] sm:$0xff]  }
  0xb0   :  { %1158 = vmatprep.subr.bf16.mxu1 %v1271_v28 }
  0xb1   :  { %1063 = vmatmul.mubr.msk.bf16.vlgmr.msra.gmra.mrb[0].mxu0 %vm220_vm0, %v1262_v24 }
  0xb2   :  { %378 = vmatprep.mubr.bf16.mxu0 %v1574_v0  ;;  %904 = vmatpush1.bf16.msra.mxu0 %v1288_v30 }
  0xb3   :  { %1159 = vmatpush3.bf16.msra.mxu1 %v1271_v28  ;;  %905 = vmatprep.subr.bf16.mxu0 %v1293_v32  ;;  %v1280_v32 = vld [vmem:[#allocation13] sm:$0xff]  }
  0xb4   :  { %1164 = vmatprep.subr.bf16.mxu1 %v1272_v29 }
  0xb6   :  { %906 = vmatpush1.bf16.msra.mxu0 %v1291_v33  ;;  %v1281_v33 = vld [vmem:[#allocation13 + $0x8] sm:$0xff]  }
  0xb7   :  { %907 = vmatprep.subr.bf16.mxu0 %v1296_v34  ;;  %v1282_v34 = vld [vmem:[#allocation13 + $0x10] sm:$0xff]  }
  0xb9   :  { %1064 = vmatmul.mubr.msk.bf16.gmra.mrb[4].mxu0 %vm220_vm0, %v1263_v25 }
  0xba   :  { %935 = vmatprep.mubr.bf16.mxu0 %v1574_v0  ;;  %908 = vmatpush1.bf16.msra.mxu0 %v1294_v35  ;;  %v1283_v35 = vld [vmem:[#allocation13 + $0x18] sm:$0xff]  }
  0xbb   :  { %909 = vmatprep.subr.bf16.mxu0 %v1299_v36  ;;  %v1284_v36 = vld [vmem:[#allocation13 + $0x20] sm:$0xff]  }
  0xbe   :  { %910 = vmatpush1.bf16.msra.mxu0 %v1297_v37  ;;  %v1285_v37 = vld [vmem:[#allocation13 + $0x28] sm:$0xff]  }
  0xbf   :  { %911 = vmatprep.subr.bf16.mxu0 %v1302_v38  ;;  %v1286_v38 = vld [vmem:[#allocation13 + $0x30] sm:$0xff]  }
  0xc2   :  { %912 = vmatpush1.bf16.msra.mxu0 %v1300_v39  ;;  %v1287_v39 = vld [vmem:[#allocation13 + $0x38] sm:$0xff]  }
  0xc3   :  { %913 = vmatprep.subr.bf16.mxu0 %v1305_v40  ;;  %v1308_v40 = vld [vmem:[#allocation14 + $0x64] ss:$8 sps:$4 sm:$0xff]  }
  0xc6   :  { %914 = vmatpush1.bf16.msra.mxu0 %v1303_v41  ;;  %v1306_v41 = vld [vmem:[#allocation14 + $0x60] ss:$8 sps:$4 sm:$0xff]  }
  0xc7   :  { %915 = vmatprep.subr.bf16.mxu0 %v1308_v40 }
  0xca   :  { %916 = vmatpush1.bf16.msra.mxu0 %v1306_v41 }
 0x184   :  { %v1762_v42 = vpop.f32.mrb[0].mxu0 }
 0x185   :  { %v389_v43 = vmul.f32 %v1762_v42, %v1762_v42  ;;  %v1766_v44 = vpop.f32.mrb[1].mxu0 }
 0x186   :  { %v393_v45 = vmul.f32 %v1766_v44, %v1766_v44  ;;  %v1770_v46 = vpop.f32.mrb[2].mxu0 }
 0x187   :  { %v390_v47 = vmul.f32 %v1770_v46, %v1770_v46  ;;  %v1774_v48 = vpop.f32.mrb[3].mxu0  ;;  %v447_v49 = vpack.c.bf16 %v1770_v46, %v1762_v42 }
 0x188   :  { %v397_v50 = vadd.f32 %v393_v45, %v389_v43  ;;  %v394_v51 = vmul.f32 %v1774_v48, %v1774_v48  ;;  %v659_v52 = vpack.c.bf16 %v1774_v48, %v1766_v44  ;;  %v1311_v43 = vld [vmem:[#allocation14 + $0x74] ss:$8 sps:$4 sm:$0xff]   ;;  %v1309_v45 = vld [vmem:[#allocation14 + $0x70] ss:$8 sps:$4 sm:$0xff]  }
 0x189   :  { %1160 = vmatprep.mubr.bf16.mxu1 %v447_v49  ;;  %917 = vmatprep.subr.bf16.mxu0 %v1311_v43 }
 0x18a   :  { %v398_v53 = vadd.f32 %v394_v51, %v390_v47  ;;  %1312 = vrsqrt.f32 %v397_v50  ;;  %vm403_vm1 = vcmp.eq.f32.partialorder %v397_v50, inf  ;;  %v406_v11 = vand.u32 2147483648, %v397_v50  ;;  %918 = vmatpush1.bf16.msra.mxu0 %v1309_v45  ;;  %v1089_v47 = vld [vmem:[%s1842_s7] ss:$0 sm:$0xff] }
 0x18b   :  { %vm405_vm3 = vcmp.eq.f32.partialorder %v397_v50, 0.0 }
 0x18c   :  { %v1782_v54 = vpop.f32.mrb[4].mxu0  ;;  %1314 = vrsqrt.f32 %v398_v53  ;;  %vm410_vm2 = vcmp.eq.f32.partialorder %v398_v53, inf  ;;  %v413_v12 = vand.u32 2147483648, %v398_v53  ;;  %vm412_vm4 = vcmp.eq.f32.partialorder %v398_v53, 0.0 }
 0x18d   :  { %v391_v55 = vmul.f32 %v1782_v54, %v1782_v54  ;;  %v1786_v56 = vpop.f32.mrb[5].mxu0 }
 0x18e   :  { %v395_v57 = vmul.f32 %v1786_v56, %v1786_v56  ;;  %v1790_v58 = vpop.f32.mrb[6].mxu0 }
 0x18f   :  { %v392_v59 = vmul.f32 %v1790_v58, %v1790_v58  ;;  %v448_v60 = vpack.c.bf16 %v1790_v58, %v1782_v54  ;;  %v1796_v61 = vpop.f32.mrb[7].mxu0 }
 0x190   :  { %v399_v63 = vadd.f32 %v395_v57, %v391_v55  ;;  %v396_v1 = vmul.f32 %v1796_v61, %v1796_v61  ;;  %v660_v2 = vpack.c.bf16 %v1796_v61, %v1786_v56 }
 0x191   :  { %1161 = vmatmul.mubr.bf16.vlgmr.msra.gmra.mrb[0].mxu1 %v448_v60 }
 0x192   :  { %1316 = vrsqrt.f32 %v399_v63  ;;  %v400_v3 = vadd.f32 %v396_v1, %v392_v59  ;;  %1165 = vmatpush3.bf16.msra.mxu1 %v1272_v29  ;;  %vm417_vm5 = vcmp.eq.f32.partialorder %v399_v63, inf  ;;  %v420_v24 = vand.u32 2147483648, %v399_v63  ;;  %v1278_v29 = vld [vmem:[#allocation10 + $0x30] sm:$0xff]  }
 0x193   :  { %1166 = vmatprep.subr.bf16.mxu1 %v1273_v62  ;;  %vm419_vm7 = vcmp.eq.f32.partialorder %v399_v63, 0.0 }
 0x194   :  { %v1313_v5 = vpop.eup %1312  ;;  %1318 = vrsqrt.f32 %v400_v3  ;;  %vm424_vm6 = vcmp.eq.f32.partialorder %v400_v3, inf  ;;  %v427_v25 = vand.u32 2147483648, %v400_v3  ;;  %vm426_vm8 = vcmp.eq.f32.partialorder %v400_v3, 0.0 }
 0x195   :  { %v402_v6 = vmul.f32 %v1313_v5, %v397_v50 }
 0x196   :  { %v1315_v7 = vpop.eup %1314  ;;  %1167 = vmatpush3.bf16.msra.mxu1 %v1273_v62 }
 0x197   :  { %1168 = vmatprep.subr.bf16.mxu1 %v1274_v4  ;;  %v404_v9 = vsel %vm403_vm1, %v397_v50, %v402_v6  ;;  %v409_v10 = vmul.f32 %v1315_v7, %v398_v53  ;;  %v811_v7 = vld [vmem:[%s1844_s9] sm:$0x3]  ;;  %s1575_s9 = smov [#allocation16]  }
 0x198   :  { %v407_v14 = vsel %vm405_vm3, %v406_v11, %v404_v9  ;;  %s1025_s19 = sshll.u32 %s1575_s9, 4  ;;  %s1026_s19 = int_to_ptr.vmem [resolvable:$true] %s1025_s19 }
 0x199   :  { %v411_v13 = vsel %vm410_vm2, %v398_v53, %v409_v10  ;;  %s1528_s25 = scalar_lea.vmem %s1026_s19, 1024  ;;  %p1533_p9 = scmp.lt.s32.totalorder %s1026_s19, %s1026_s19 }
 0x19a   :  { %1169 = vmatpush3.bf16.msra.mxu1 %v1274_v4  ;;  %v414_v15 = vsel %vm412_vm4, %v413_v12, %v411_v13  ;;  %v813_v4 = vlaneseq  ;;  %p1529_p8 = scmp.ne.s32.totalorder %s1026_s19, %s1528_s25  ;;  %p1534_p10 = scmp.lt.s32.totalorder %s1528_s25, %s1528_s25 }
 0x19b   :  { %1170 = vmatprep.subr.bf16.mxu1 %v1275_v8  ;;  %v429_v16 = vpack.c.bf16 %v414_v15, %v407_v14 }
 0x19c   :  { %v1317_v18 = vpop.eup %1316  ;;  %v814_v5 = vshrl.u32 %v813_v4, 7  ;;  %p1535_p11 = por %p1534_p10, %p1533_p9 }
 0x19d   :  { %1180 = vmatprep.mubr.bf16.mxu1 %v429_v16  ;;  %v416_v19 = vmul.f32 %v1317_v18, %v399_v63 }
 0x19e   :  { %v1319_v20 = vpop.eup %1318  ;;  %1171 = vmatpush3.bf16.msra.mxu1 %v1275_v8  ;;  %v815_v6 = vsub.s32 0, %v814_v5  ;;  %v819_v8 = vsub.s32 1, %v814_v5  ;;  %p1536_p12 = pnand %p1535_p11, %p1529_p8 }
 0x19f   :  { %1172 = vmatprep.subr.bf16.mxu1 %v1276_v17  ;;  %v418_v22 = vsel %vm417_vm5, %v399_v63, %v416_v19  ;;  %v423_v23 = vmul.f32 %v1319_v20, %v400_v3 }
 0x1a0   :  { %v421_v27 = vsel %vm419_vm7, %v420_v24, %v418_v22  ;;  %v816_v9 = vrot.slane %v811_v7, %v815_v6  ;;  %v820_v10 = vrot.slane %v811_v7, %v819_v8 }
 0x1a1   :  { %v425_v26 = vsel %vm424_vm6, %v400_v3, %v423_v23 }
 0x1a2   :  { %1173 = vmatpush3.bf16.msra.mxu1 %v1276_v17  ;;  %v428_v28 = vsel %vm426_vm8, %v427_v25, %v425_v26 }
 0x1a3   :  { %1174 = vmatprep.subr.bf16.mxu1 %v1277_v21  ;;  %v430_v30 = vpack.c.bf16 %v428_v28, %v421_v27 }
 0x1a6   :  { %1175 = vmatpush3.bf16.msra.mxu1 %v1277_v21 }
 0x1a7   :  { %1176 = vmatprep.subr.bf16.mxu1 %v1278_v29 }
 0x1aa   :  { %1177 = vmatpush3.bf16.msra.mxu1 %v1278_v29 }
 0x1ab   :  { %1178 = vmatprep.subr.bf16.mxu1 %v1279_v31 }
 0x1ae   :  { %1179 = vmatpush3.bf16.msra.mxu1 %v1279_v31 }
 0x1af   :  { %1184 = vmatprep.subr.bf16.mxu1 %v1280_v32 }
 0x1b1   :  { %1181 = vmatmul.mubr.bf16.vlgmr.msra.gmra.mrb[0].mxu1 %v430_v30 }
 0x1b2   :  { %1185 = vmatpush3.bf16.msra.mxu1 %v1280_v32  ;;  %1200 = vmatprep.mubr.bf16.mxu1 %v659_v52 }
 0x1b3   :  { %1186 = vmatprep.subr.bf16.mxu1 %v1281_v33 }
 0x1b6   :  { %1187 = vmatpush3.bf16.msra.mxu1 %v1281_v33 }
 0x1b7   :  { %1188 = vmatprep.subr.bf16.mxu1 %v1282_v34 }
 0x1ba   :  { %1189 = vmatpush3.bf16.msra.mxu1 %v1282_v34 }
 0x1bb   :  { %1190 = vmatprep.subr.bf16.mxu1 %v1283_v35 }
 0x1be   :  { %1191 = vmatpush3.bf16.msra.mxu1 %v1283_v35 }
 0x1bf   :  { %1192 = vmatprep.subr.bf16.mxu1 %v1284_v36 }
 0x1c2   :  { %1193 = vmatpush3.bf16.msra.mxu1 %v1284_v36 }
 0x1c3   :  { %1194 = vmatprep.subr.bf16.mxu1 %v1285_v37 }
 0x1c6   :  { %1195 = vmatpush3.bf16.msra.mxu1 %v1285_v37 }
 0x1c7   :  { %1196 = vmatprep.subr.bf16.mxu1 %v1286_v38 }
 0x1ca   :  { %1197 = vmatpush3.bf16.msra.mxu1 %v1286_v38 }
 0x1cb   :  { %1198 = vmatprep.subr.bf16.mxu1 %v1287_v39 }
 0x1ce   :  { %1199 = vmatpush3.bf16.msra.mxu1 %v1287_v39 }
 0x1d1   :  { %1201 = vmatmul.mubr.bf16.vlgmr.msra.gmra.mrb[0].mxu1 %v660_v2 }
 0x2a4   :  { %v1202_v49 = vpop.f32.mrb[0].mxu1 }
 0x2a5   :  { %v787_v50 = vadd.f32 %v1202_v49, %v1089_v47  ;;  %v759_v51 = vpop.f32.mrb[1].mxu1 }
 0x2a6   :  { %v785_v52 = vadd.f32 %v1089_v47, %v759_v51  ;;  %v1203_v53 = vpop.f32.mrb[2].mxu1 }
 0x2a7   :  { %v788_v55 = vadd.f32 %v1203_v53, %v1089_v47  ;;  %v762_v57 = vpop.f32.mrb[3].mxu1  ;;  %v791_v60 = vmax.f32 %v787_v50, 0.0 }
 0x2a8   :  { %v786_v59 = vadd.f32 %v1089_v47, %v762_v57  ;;  %v789_v63 = vmax.f32 %v785_v52, 0.0 }
 0x2a9   :  { %v792_v62 = vmax.f32 %v788_v55, 0.0 }
 0x2aa   :  { %v790_v1 = vmax.f32 %v786_v59, 0.0 }
 0x2ab   :  { %v794_v2 = vpack.c.bf16 %v792_v62, %v791_v60 }
 0x2ac   :  { %v793_v3 = vpack.c.bf16 %v790_v1, %v789_v63 }
 0x2ae   :  { %936 = vmatmul.mubr.bf16.vlgmr.msra.gmra.mrb[8].mxu0 %v793_v3 }
 0x2af   :  { %945 = vmatprep.mubr.bf16.mxu0 %v1574_v0 }
 0x2b6   :  { %946 = vmatmul.mubr.bf16.gmra.mrb[12].mxu0 %v794_v2 }
 0x381   :  { %v937_v11 = vpop.f32.mrb[8].mxu0 }
 0x382   :  { %v938_v12 = vadd.f32 %v937_v11, %v816_v9  ;;  %v939_v13 = vpop.f32.mrb[9].mxu0 }
 0x383   :  { %v940_v14 = vadd.f32 %v939_v13, %v820_v10  ;;  %v941_v15 = vpop.f32.mrb[10].mxu0 }
 0x384   :  { %v1106_v16 = vmul.f32 -1.442695, %v938_v12  ;;  %v942_v17 = vadd.f32 %v941_v15, %v816_v9  ;;  %v943_v18 = vpop.f32.mrb[11].mxu0 }
 0x385   :  { %v1107_v0 = vmul.f32 -1.442695, %v940_v14  ;;  %v944_v19 = vadd.f32 %v943_v18, %v820_v10 }
 0x386   :  { %1320 = vpow2.f32 %v1106_v16  ;;  %v1108_v20 = vmul.f32 -1.442695, %v942_v17 }
 0x387   :  { %1322 = vpow2.f32 %v1107_v0  ;;  %v1109_v21 = vmul.f32 -1.442695, %v944_v19 }
 0x388   :  { %1324 = vpow2.f32 %v1108_v20 }
 0x389   :  { %1326 = vpow2.f32 %v1109_v21  ;;  %v947_v22 = vpop.f32.mrb[12].mxu0 }
 0x38a   :  { %v948_v23 = vadd.f32 %v947_v22, %v816_v9  ;;  %v949_v24 = vpop.f32.mrb[13].mxu0 }
 0x38b   :  { %v950_v25 = vadd.f32 %v949_v24, %v820_v10  ;;  %v951_v26 = vpop.f32.mrb[14].mxu0 }
 0x38c   :  { %v1110_v27 = vmul.f32 -1.442695, %v948_v23  ;;  %v952_v28 = vadd.f32 %v951_v26, %v816_v9  ;;  %v953_v29 = vpop.f32.mrb[15].mxu0 }
 0x38d   :  { %v1111_v30 = vmul.f32 -1.442695, %v950_v25  ;;  %v954_v31 = vadd.f32 %v953_v29, %v820_v10 }
 0x38e   :  { %1328 = vpow2.f32 %v1110_v27  ;;  %v1112_v32 = vmul.f32 -1.442695, %v952_v28 }
 0x38f   :  { %1330 = vpow2.f32 %v1111_v30  ;;  %v1113_v33 = vmul.f32 -1.442695, %v954_v31 }
 0x390   :  { %v1321_v34 = vpop.eup %1320  ;;  %1332 = vpow2.f32 %v1112_v32 }
 0x391   :  { %v1323_v35 = vpop.eup %1322  ;;  %v980_v36 = vadd.f32 1.0, %v1321_v34  ;;  %1334 = vpow2.f32 %v1113_v33 }
 0x392   :  { %v1325_v37 = vpop.eup %1324  ;;  %v981_v38 = vadd.f32 1.0, %v1323_v35 }
 0x393   :  { %v1327_v39 = vpop.eup %1326  ;;  %1336 = vrcp.f32 %v980_v36  ;;  %v982_v40 = vadd.f32 1.0, %v1325_v37 }
 0x394   :  { %1338 = vrcp.f32 %v981_v38  ;;  %v983_v41 = vadd.f32 1.0, %v1327_v39 }
 0x395   :  { %1340 = vrcp.f32 %v982_v40 }
 0x396   :  { %1342 = vrcp.f32 %v983_v41 }
 0x398   :  { %v1329_v43 = vpop.eup %1328 }
 0x399   :  { %v1331_v45 = vpop.eup %1330  ;;  %v984_v47 = vadd.f32 1.0, %v1329_v43 }
 0x39a   :  { %v1333_v49 = vpop.eup %1332  ;;  %v985_v50 = vadd.f32 1.0, %v1331_v45 }
 0x39b   :  { %v1335_v51 = vpop.eup %1334  ;;  %1344 = vrcp.f32 %v984_v47  ;;  %v986_v52 = vadd.f32 1.0, %v1333_v49 }
 0x39c   :  { %1346 = vrcp.f32 %v985_v50  ;;  %v987_v53 = vadd.f32 1.0, %v1335_v51 }
 0x39d   :  { %v1337_v55 = vpop.eup %1336  ;;  %1348 = vrcp.f32 %v986_v52 }
 0x39e   :  { %v1339_v57 = vpop.eup %1338  ;;  %v1004_v59 = vmul.f32 %v1337_v55, %v1762_v42  ;;  %1350 = vrcp.f32 %v987_v53 }
 0x39f   :  { %v1341_v60 = vpop.eup %1340  ;;  %v1005_v62 = vmul.f32 %v1339_v57, %v1766_v44 }
 0x3a0   :  { %v1343_v63 = vpop.eup %1342  ;;  %1012 = vst [vmem:[#allocation16] sm:$0xff] %v1004_v59  ;;  %v1006_v1 = vmul.f32 %v1341_v60, %v1770_v46 }
 0x3a1   :  { %1013 = vst [vmem:[#allocation16 + $0x8] sm:$0xff] %v1005_v62  ;;  %v1007_v2 = vmul.f32 %v1343_v63, %v1774_v48 }
 0x3a2   :  { %1014 = vst [vmem:[#allocation16 + $0x10] sm:$0xff] %v1006_v1 }
 0x3a3   :  { %1015 = vst [vmem:[#allocation16 + $0x18] sm:$0xff] %v1007_v2 }
 0x3a5   :  { %v1345_v3 = vpop.eup %1344 }
 0x3a6   :  { %v1347_v4 = vpop.eup %1346  ;;  %v1008_v5 = vmul.f32 %v1345_v3, %v1782_v54 }
 0x3a7   :  { %v1349_v42 = vpop.eup %1348  ;;  %v1009_v6 = vmul.f32 %v1347_v4, %v1786_v56 }
 0x3a8   :  { %v1351_v7 = vpop.eup %1350  ;;  %1016 = vst [vmem:[#allocation16 + $0x20] sm:$0xff] %v1008_v5  ;;  %v1010_v44 = vmul.f32 %v1349_v42, %v1790_v58 }
 0x3a9   :  { %1017 = vst [vmem:[#allocation16 + $0x28] sm:$0xff] %v1009_v6  ;;  %v1011_v46 = vmul.f32 %v1351_v7, %v1796_v61 }
 0x3aa   :  { %1018 = vst [vmem:[#allocation16 + $0x30] sm:$0xff] %v1010_v44 }
 0x3ab   :  { %1019 = vst [vmem:[#allocation16 + $0x38] sm:$0xff] %v1011_v46 }
 0x3ac   :  { %1539 = shalt.err (!%p1536_p12)
}
 0x3ad   :  { %s1540_s28 = scalar_lea.hbm %s1845_s10, 1024 }
 0x3ae   :  { %p1541_p13 = scmp.ne.s32.totalorder %s1845_s10, %s1540_s28  ;;  %p1544_p0 = scmp.lt.u32.totalorder %s1540_s28, %s1845_s10 }
 0x3b0   :  { %p1546_p1 = pnand %p1544_p0, %p1541_p13 }
 0x3b2   :  { %1549 = shalt.err (!%p1546_p1)
}
 0x3b3   :  { %s1576_s16 = smov 256   ;;  %s1577_s20 = smov 16  }
 0x3b4   :  { %1031 = dma.vmem_to_hbm [thread:$0]  %s1026_s19, 1024, %s1845_s10, [#allocation4], %s1576_s16, %s1576_s16, %s1577_s20  }
 0x3b5   :  { %1560 = dma.done.wait [#allocation4], 1024  }
 0x3b6   :  { %1561 = vsyncadd [#allocation4], 4294966272 }
 0x3b7   :  { %1035 = vsyncpa [#allocation3], 1 }
 0x3b8   :  { %1036 = vsyncpa [#allocation6], 1 }
 0x3b9   :  { %1037 = vsyncpa [#allocation9], 1 }
 0x3ba   :  { %1038 = vsyncpa [#allocation12], 1 }
 0x3bb   :  { %1039 = vsyncpa [#allocation15], 1 }
 0x3bc   :  { %1040 = vsyncpa [#allocation4], 1 }

</bundles_post_ra>
